<compile_context>
chip_gen: v5e
topology: v5e:2x2
jax: 0.10.0
libtpu: 0.0.40
codegen_flags: <defaults>
</compile_context>

<pallas_src>
import functools

import jax
import jax.numpy as jnp
import numpy as np
from jax.experimental import pallas as pl
from jax.experimental.pallas import tpu as pltpu


# -----------------------------------------------------------------------------
# Pallas kernel: fused detector head matmul + GroundingDINO post-processing +
# one-hot heat-map write, vectorized over the whole BN batch in one grid step.
# -----------------------------------------------------------------------------
def _heatmap_kernel(feat_ref, w_ref, hm_ref, *, H, W, BN, NQ, NT):
    # feat_ref: (BN*NQ, D)   w_ref: (D, NT+4)   hm_ref: (BN, H*W)
    feat = feat_ref[...]

    # One fused matmul for the whole batch (logits head and box head together),
    # then a single sigmoid pass over the fused result.
    fused = jnp.dot(feat, w_ref[...], preferred_element_type=jnp.float32)   # (BN*NQ, NT+4)
    prob = jax.nn.sigmoid(fused)

    # Leading-dim split (physically a no-op for the (8,128) layout).
    prob3 = prob.reshape(BN, NQ, NT + 4)                                    # (BN, NQ, NT+4)

    # prediction_logits.sigmoid().max(dim=-1)[0]  -> lane reduction.
    ml = jnp.max(prob3[:, :, :NT], axis=-1)                                 # (BN, NQ)
    bx = prob3[:, :, NT + 0]                                                # cx in [0,1]
    by = prob3[:, :, NT + 1]                                                # cy
    bw = prob3[:, :, NT + 2]                                                # w
    bh = prob3[:, :, NT + 3]                                                # h

    # Box filters (exact batch_predict semantics).  Sigmoid output is >= 0, so
    # the int32 cast truncates toward zero exactly like torch's .int().
    ml = jnp.where(bw * bh > 0.81, 0.0, ml)
    ml = jnp.where((bw * W).astype(jnp.int32) <= 1, 0.0, ml)
    ml = jnp.where((bh * H).astype(jnp.int32) <= 1, 0.0, ml)

    # Top-1 query per batch item (forward asserts K == 1).  First-occurrence
    # tie-break (min index among maxima) matches torch.topk / jnp.argmax.
    q_iota = jax.lax.broadcasted_iota(jnp.int32, (BN, NQ), 1)
    mx = jnp.max(ml, axis=-1, keepdims=True)                                # (BN, 1)
    top = jnp.min(jnp.where(ml == mx, q_iota, NQ), axis=-1, keepdims=True)  # (BN, 1)
    onehot = (q_iota == top).astype(jnp.float32)                            # (BN, NQ)

    # Gather winning box (exact: one-hot sum) and convert to pixels.
    x_px = (jnp.sum(bx * onehot, axis=-1, keepdims=True) * W).astype(jnp.int32)  # (BN, 1)
    y_px = (jnp.sum(by * onehot, axis=-1, keepdims=True) * H).astype(jnp.int32)  # (BN, 1)
    # Clamp to the image (torch would raise if sigmoid saturated to exactly 1.0;
    # clamping keeps exactly one hot pixel per heat-map).
    x_px = jnp.clip(x_px, 0, W - 1)
    y_px = jnp.clip(y_px, 0, H - 1)
    flat = y_px * W + x_px                                                  # (BN, 1)

    # hm[i, y, x] = 1.0 via a broadcast-compare "scatter" over the flattened,
    # lane-dense (BN, H*W) output (H*W is a multiple of 128 here).
    pix = jax.lax.broadcasted_iota(jnp.int32, (BN, H * W), 1)
    hm_ref[...] = (pix == flat).astype(jnp.float32)


def grounding_dino_heatmap_forward(images, w_logits, w_box, *,
                                   resize_size=8, num_queries=8):
    """Forward pass of GroundingDinoHeatMap returning {'trans': (b, nv, h, w)}."""
    b, nv, _, h, w = images.shape
    bn = b * nv

    # Glue (plain JAX): channel select 3:6, resize, flatten into query features.
    rgb = images[:, :, 3:6, :, :].reshape(bn, 3, h, w)
    resized = jax.image.resize(rgb, (bn, 3, resize_size, resize_size),
                               method="bilinear")
    d = 3 * resize_size * resize_size // num_queries
    feat = resized.reshape(bn * num_queries, d).astype(jnp.float32)         # (BN*NQ, D)

    nt = w_logits.shape[1]
    # Fuse the two head matrices: one matmul, one sigmoid pass in-kernel.
    w_fused = jnp.concatenate([w_logits, w_box], axis=1).astype(jnp.float32)  # (D, NT+4)

    kernel = functools.partial(_heatmap_kernel, H=h, W=w, BN=bn,
                               NQ=num_queries, NT=nt)

    # Single grid step over the whole batch: whole-array VMEM residents, no
    # per-item pipeline prologues, lane-dense (BN, H*W) output store.
    # (On v7x one could split into 2 parallel steps to feed both TensorCores;
    #  at these sizes the difference is marginal.)
    hm = pl.pallas_call(
        kernel,
        out_shape=jax.ShapeDtypeStruct((bn, h * w), jnp.float32),
        in_specs=[
            pl.BlockSpec(memory_space=pltpu.MemorySpace.VMEM),
            pl.BlockSpec(memory_space=pltpu.MemorySpace.VMEM),
        ],
        out_specs=pl.BlockSpec(memory_space=pltpu.MemorySpace.VMEM),
    )(feat, w_fused)

    return {"trans": hm.reshape(b, nv, h, w)}


# -----------------------------------------------------------------------------
# Pure-JAX reference (same synthetic head) for correctness checking.
# -----------------------------------------------------------------------------
def reference_forward(images, w_logits, w_box, *, resize_size=8, num_queries=8):
    b, nv, _, h, w = images.shape
    bn = b * nv
    rgb = images[:, :, 3:6, :, :].reshape(bn, 3, h, w)
    resized = jax.image.resize(rgb, (bn, 3, resize_size, resize_size),
                               method="bilinear")
    d = 3 * resize_size * resize_size // num_queries
    feat = resized.reshape(bn, num_queries, d).astype(jnp.float32)

    logits = jnp.einsum("bqd,dn->bqn", feat, w_logits)
    boxes = jax.nn.sigmoid(jnp.einsum("bqd,dn->bqn", feat, w_box))
    prob = jax.nn.sigmoid(logits)
    max_logits = prob.max(axis=-1)
    bw, bh = boxes[..., 2], boxes[..., 3]
    max_logits = jnp.where(bw * bh > 0.81, 0.0, max_logits)
    max_logits = jnp.where((bw * w).astype(jnp.int32) <= 1, 0.0, max_logits)
    max_logits = jnp.where((bh * h).astype(jnp.int32) <= 1, 0.0, max_logits)
    top = jnp.argmax(max_logits, axis=-1)
    top_box = jnp.take_along_axis(boxes, top[:, None, None], axis=1)[:, 0]   # (BN, 4)
    px = (top_box * jnp.array([w, h, w, h], jnp.float32)).astype(jnp.int32)
    x_px = jnp.clip(px[:, 0], 0, w - 1)
    y_px = jnp.clip(px[:, 1], 0, h - 1)
    hm = jnp.zeros((bn, h, w), jnp.float32)
    hm = hm.at[jnp.arange(bn), y_px, x_px].set(1.0)
    return {"trans": hm.reshape(b, nv, h, w)}


if __name__ == "__main__":
    # Small deterministic shapes: b=2, nv=2, C=7 (channels 3:6 are RGB), h=w=16.
    b, nv, c, h, w = 2, 2, 7, 16, 16
    resize_size = 8
    num_queries = 8
    d = 3 * resize_size * resize_size // num_queries   # 24
    num_text_tokens = 32

    key = jax.random.PRNGKey(0)
    k_img, k_wl, k_wb = jax.random.split(key, 3)
    images = jax.random.uniform(k_img, (b, nv, c, h, w), dtype=jnp.float32)
    w_logits = (jax.random.normal(k_wl, (d, num_text_tokens), dtype=jnp.float32)
                * 0.5)
    w_box = jax.random.normal(k_wb, (d, 4), dtype=jnp.float32) * 0.5

    out = grounding_dino_heatmap_forward(
        images, w_logits, w_box,
        resize_size=resize_size, num_queries=num_queries)
    hm = jax.block_until_ready(out["trans"])

    ref = reference_forward(
        images, w_logits, w_box,
        resize_size=resize_size, num_queries=num_queries)["trans"]

    np.testing.assert_allclose(np.asarray(hm), np.asarray(ref), atol=0, rtol=0)
    assert hm.shape == (b, nv, h, w)
    # Each (b, nv) heat-map contains exactly one 1.0 pixel.
    assert float(jnp.sum(hm)) == b * nv
    print("KERNEL_OK")
</pallas_src>

<mosaic_0001>
module attributes {stable_mosaic.version = 11 : i64} {
  func.func @_heatmap_kernel(%arg0: memref<32x24xf32, #tpu.memory_space<vmem>>, %arg1: memref<24x36xf32, #tpu.memory_space<vmem>>, %arg2: memref<4x256xf32, #tpu.memory_space<vmem>>) attributes {dimension_semantics = [], scalar_prefetch = 0 : i64, scratch_operands = 0 : i64, tpu.core_type = #tpu.core_type<tc>} {
    %c0 = arith.constant 0 : index
    %c0_0 = arith.constant 0 : index
    %0 = vector.load %arg0[%c0, %c0_0] : memref<32x24xf32, #tpu.memory_space<vmem>>, vector<32x24xf32>
    %c0_1 = arith.constant 0 : index
    %c0_2 = arith.constant 0 : index
    %1 = vector.load %arg1[%c0_1, %c0_2] : memref<24x36xf32, #tpu.memory_space<vmem>>, vector<24x36xf32>
    %cst = arith.constant dense<0.000000e+00> : vector<32x36xf32>
    %2 = tpu.matmul %0, %1, %cst {dimension_numbers = #tpu.dot_dimension_numbers<[1], [0], [0], [1], [0, 0, 1, 1], [], []>} : vector<32x24xf32>, vector<24x36xf32>, vector<32x36xf32> -> vector<32x36xf32>
    %3 = arith.negf %2 : vector<32x36xf32>
    %4 = math.exp %3 : vector<32x36xf32>
    %cst_3 = arith.constant 1.000000e+00 : f32
    %5 = vector.broadcast %cst_3 : f32 to vector<32x36xf32>
    %6 = arith.addf %5, %4 : vector<32x36xf32>
    %7 = arith.divf %5, %6 : vector<32x36xf32>
    %8 = vector.shape_cast %7 : vector<32x36xf32> to vector<4x8x36xf32>
    %9 = vector.extract_strided_slice %8 {offsets = [0, 0, 0], sizes = [4, 8, 32], strides = [1, 1, 1]} : vector<4x8x36xf32> to vector<4x8x32xf32>
    %cst_4 = arith.constant dense<0xFF800000> : vector<4x8xf32>
    %10 = vector.multi_reduction <maximumf>, %9, %cst_4 [2] : vector<4x8x32xf32> to vector<4x8xf32>
    %11 = vector.extract_strided_slice %8 {offsets = [0, 0, 32], sizes = [4, 8, 1], strides = [1, 1, 1]} : vector<4x8x36xf32> to vector<4x8x1xf32>
    %12 = vector.shape_cast %11 : vector<4x8x1xf32> to vector<4x8xf32>
    %13 = vector.extract_strided_slice %8 {offsets = [0, 0, 33], sizes = [4, 8, 1], strides = [1, 1, 1]} : vector<4x8x36xf32> to vector<4x8x1xf32>
    %14 = vector.shape_cast %13 : vector<4x8x1xf32> to vector<4x8xf32>
    %15 = vector.extract_strided_slice %8 {offsets = [0, 0, 34], sizes = [4, 8, 1], strides = [1, 1, 1]} : vector<4x8x36xf32> to vector<4x8x1xf32>
    %16 = vector.shape_cast %15 : vector<4x8x1xf32> to vector<4x8xf32>
    %17 = vector.extract_strided_slice %8 {offsets = [0, 0, 35], sizes = [4, 8, 1], strides = [1, 1, 1]} : vector<4x8x36xf32> to vector<4x8x1xf32>
    %18 = vector.shape_cast %17 : vector<4x8x1xf32> to vector<4x8xf32>
    %19 = arith.mulf %16, %18 : vector<4x8xf32>
    %cst_5 = arith.constant 8.100000e-01 : f32
    %20 = vector.broadcast %cst_5 : f32 to vector<4x8xf32>
    %21 = arith.cmpf ogt, %19, %20 : vector<4x8xf32>
    %cst_6 = arith.constant 0.000000e+00 : f32
    %22 = vector.broadcast %cst_6 : f32 to vector<4x8xf32>
    %23 = arith.select %21, %22, %10 : vector<4x8xi1>, vector<4x8xf32>
    %cst_7 = arith.constant 1.600000e+01 : f32
    %24 = vector.broadcast %cst_7 : f32 to vector<4x8xf32>
    %25 = arith.mulf %16, %24 : vector<4x8xf32>
    %26 = arith.fptosi %25 : vector<4x8xf32> to vector<4x8xi32>
    %c1_i32 = arith.constant 1 : i32
    %27 = vector.broadcast %c1_i32 : i32 to vector<4x8xi32>
    %28 = arith.cmpi sle, %26, %27 : vector<4x8xi32>
    %cst_8 = arith.constant 0.000000e+00 : f32
    %29 = vector.broadcast %cst_8 : f32 to vector<4x8xf32>
    %30 = arith.select %28, %29, %23 : vector<4x8xi1>, vector<4x8xf32>
    %cst_9 = arith.constant 1.600000e+01 : f32
    %31 = vector.broadcast %cst_9 : f32 to vector<4x8xf32>
    %32 = arith.mulf %18, %31 : vector<4x8xf32>
    %33 = arith.fptosi %32 : vector<4x8xf32> to vector<4x8xi32>
    %c1_i32_10 = arith.constant 1 : i32
    %34 = vector.broadcast %c1_i32_10 : i32 to vector<4x8xi32>
    %35 = arith.cmpi sle, %33, %34 : vector<4x8xi32>
    %cst_11 = arith.constant 0.000000e+00 : f32
    %36 = vector.broadcast %cst_11 : f32 to vector<4x8xf32>
    %37 = arith.select %35, %36, %30 : vector<4x8xi1>, vector<4x8xf32>
    %38 = tpu.iota {dimensions = array<i32: 1>} : vector<4x8xi32>
    %cst_12 = arith.constant dense<0xFF800000> : vector<4xf32>
    %39 = vector.multi_reduction <maximumf>, %37, %cst_12 [1] : vector<4x8xf32> to vector<4xf32>
    %40 = vector.shape_cast %39 : vector<4xf32> to vector<4x1xf32>
    %41 = vector.broadcast %40 : vector<4x1xf32> to vector<4x8xf32>
    %42 = arith.cmpf oeq, %37, %41 : vector<4x8xf32>
    %c8_i32 = arith.constant 8 : i32
    %43 = vector.broadcast %c8_i32 : i32 to vector<4x8xi32>
    %44 = arith.select %42, %38, %43 : vector<4x8xi1>, vector<4x8xi32>
    %cst_13 = arith.constant dense<2147483647> : vector<4xi32>
    %45 = vector.multi_reduction <minsi>, %44, %cst_13 [1] : vector<4x8xi32> to vector<4xi32>
    %46 = vector.shape_cast %45 : vector<4xi32> to vector<4x1xi32>
    %47 = vector.broadcast %46 : vector<4x1xi32> to vector<4x8xi32>
    %48 = arith.cmpi eq, %38, %47 : vector<4x8xi32>
    %49 = arith.extui %48 : vector<4x8xi1> to vector<4x8xi32>
    %50 = arith.sitofp %49 : vector<4x8xi32> to vector<4x8xf32>
    %51 = arith.mulf %12, %50 : vector<4x8xf32>
    %cst_14 = arith.constant dense<0.000000e+00> : vector<4xf32>
    %52 = vector.multi_reduction <add>, %51, %cst_14 [1] : vector<4x8xf32> to vector<4xf32>
    %53 = vector.shape_cast %52 : vector<4xf32> to vector<4x1xf32>
    %cst_15 = arith.constant 1.600000e+01 : f32
    %54 = vector.broadcast %cst_15 : f32 to vector<4x1xf32>
    %55 = arith.mulf %53, %54 : vector<4x1xf32>
    %56 = arith.fptosi %55 : vector<4x1xf32> to vector<4x1xi32>
    %57 = arith.mulf %14, %50 : vector<4x8xf32>
    %cst_16 = arith.constant dense<0.000000e+00> : vector<4xf32>
    %58 = vector.multi_reduction <add>, %57, %cst_16 [1] : vector<4x8xf32> to vector<4xf32>
    %59 = vector.shape_cast %58 : vector<4xf32> to vector<4x1xf32>
    %cst_17 = arith.constant 1.600000e+01 : f32
    %60 = vector.broadcast %cst_17 : f32 to vector<4x1xf32>
    %61 = arith.mulf %59, %60 : vector<4x1xf32>
    %62 = arith.fptosi %61 : vector<4x1xf32> to vector<4x1xi32>
    %c0_i32 = arith.constant 0 : i32
    %c15_i32 = arith.constant 15 : i32
    %63 = vector.broadcast %c0_i32 : i32 to vector<4x1xi32>
    %64 = arith.maxsi %63, %56 : vector<4x1xi32>
    %65 = vector.broadcast %c15_i32 : i32 to vector<4x1xi32>
    %66 = arith.minsi %65, %64 : vector<4x1xi32>
    %c0_i32_18 = arith.constant 0 : i32
    %c15_i32_19 = arith.constant 15 : i32
    %67 = vector.broadcast %c0_i32_18 : i32 to vector<4x1xi32>
    %68 = arith.maxsi %67, %62 : vector<4x1xi32>
    %69 = vector.broadcast %c15_i32_19 : i32 to vector<4x1xi32>
    %70 = arith.minsi %69, %68 : vector<4x1xi32>
    %c16_i32 = arith.constant 16 : i32
    %71 = vector.broadcast %c16_i32 : i32 to vector<4x1xi32>
    %72 = arith.muli %70, %71 : vector<4x1xi32>
    %73 = arith.addi %72, %66 : vector<4x1xi32>
    %74 = tpu.iota {dimensions = array<i32: 1>} : vector<4x256xi32>
    %75 = vector.broadcast %73 : vector<4x1xi32> to vector<4x256xi32>
    %76 = arith.cmpi eq, %74, %75 : vector<4x256xi32>
    %77 = arith.extui %76 : vector<4x256xi1> to vector<4x256xi32>
    %78 = arith.sitofp %77 : vector<4x256xi32> to vector<4x256xf32>
    %c0_20 = arith.constant 0 : index
    %c0_21 = arith.constant 0 : index
    %79 = vector.load %arg2[%c0_20, %c0_21] : memref<4x256xf32, #tpu.memory_space<vmem>>, vector<4x256xf32>
    tpu.vector_store %arg2[%c0_20, %c0_21], %78 {strides = array<i32>} : memref<4x256xf32, #tpu.memory_space<vmem>>, vector<4x256xf32>,
    return
  }
}

</mosaic_0001>

<bundles_post_ra>
// kernel: tpu_custom_call.1
= control target key start
LH: loop header
LB: loop body
LE: loop exit
PB: predicated region body
PF: predicated region fallthrough
CT: control target
= control target key end

     0   :  { %s723_s0 = inlined_call_operand.vmem [shape: f32[32,24], index: 0, kind: input, shape index: {}]   ;;  %s724_s1 = inlined_call_operand.vmem [shape: f32[24,36], index: 1, kind: input, shape index: {}]   ;;  %s725_s2 = inlined_call_operand.hbm [shape: f32[4,256], index: 2, kind: output, shape index: {}]  }
   0x1   :  { %v18_v0 = vld [vmem:[%s724_s1 + $0x10] sm:$0xff]  ;;  %v17_v1 = vld [vmem:[%s724_s1 + $0x8] sm:$0xff]  ;;  %v16_v2 = vld [vmem:[%s724_s1] sm:$0xff] }
   0x2   :  { %45 = vmatpush.msra.mxu0 %v18_v0  ;;  %449 = vmatpush.msra.mxu1 %v18_v0 }
   0x3   :  { %450 = vmatpush.msra.mxu2 %v18_v0  ;;  %451 = vmatpush.msra.mxu3 %v18_v0 }
   0x4   :  { %7 = vsyncpa [#allocation3], 0  ;;  %46 = vmatpush.msra.mxu0 %v17_v1  ;;  %452 = vmatpush.msra.mxu1 %v17_v1  ;;  %v12_v3 = vld [vmem:[%s723_s0] sm:$0xff]  ;;  %vm19_vm0 = vcmask 195584   ;;  %v13_v4 = vld [vmem:[%s723_s0 + $0x8] sm:$0xff]  ;;  %vm137_vm8 = vcmask 261120  }
   0x5   :  { %453 = vmatpush.msra.mxu2 %v17_v1  ;;  %v14_v5 = vld [vmem:[%s723_s0 + $0x10] sm:$0xff]  ;;  %454 = vmatpush.msra.mxu3 %v17_v1  ;;  %v15_v6 = vld [vmem:[%s723_s0 + $0x18] sm:$0xff]  ;;  %s558_s0 = smov 127   ;;  %s559_s22 = smov 1  }
   0x6   :  { %47 = vmatpush.msra.mxu0 %v16_v2  ;;  %455 = vmatpush.msra.mxu1 %v16_v2  ;;  %s564_s23 = smov [#allocation2]   ;;  %s429_s27 = sshll.u32 %s725_s2, 4  ;;  %s430_s27 = int_to_ptr.hbm [resolvable:$true] %s429_s27 }
   0x7   :  { %456 = vmatpush.msra.mxu2 %v16_v2  ;;  %438 = vmatmul.msk.f32.vlgmr.msra.gmra.mxu0 %vm19_vm0, %v12_v3  ;;  %s427_s24 = sshll.u32 %s564_s23, 4  ;;  %s428_s24 = int_to_ptr.vmem [resolvable:$true] %s427_s24 }
   0x8   :  { %439 = vmatmul.msk.f32.vlgmr.msra.gmra.mxu1 %vm19_vm0, %v13_v4  ;;  %440 = vmatmul.msk.f32.vlgmr.msra.gmra.mxu2 %vm19_vm0, %v14_v5 }
   0x9   :  { %457 = vmatpush.msra.mxu3 %v16_v2 }
   0xa   :  { %441 = vmatmul.msk.f32.vlgmr.msra.gmra.mxu3 %vm19_vm0, %v15_v6 }
  0x84   :  { %v49_v7 = vpop.f32.mrf.mxu0 }
  0x85   :  { %v442_v8 = vmul.f32 -1.442695, %v49_v7  ;;  %v52_v9 = vpop.f32.mrf.mxu1 }
  0x86   :  { %v443_v10 = vmul.f32 -1.442695, %v52_v9 }
  0x87   :  { %516 = vpow2.f32 %v442_v8 }
  0x88   :  { %518 = vpow2.f32 %v443_v10 }
  0x8b   :  { %v55_v11 = vpop.f32.mrf.mxu2 }
  0x8c   :  { %v444_v12 = vmul.f32 -1.442695, %v55_v11 }
  0x8d   :  { %v517_v13 = vpop.eup %516  ;;  %v58_v14 = vpop.f32.mrf.mxu3 }
  0x8e   :  { %v519_v15 = vpop.eup %518  ;;  %v73_v16 = vadd.f32 1.0, %v517_v13  ;;  %520 = vpow2.f32 %v444_v12  ;;  %v445_v17 = vmul.f32 -1.442695, %v58_v14 }
  0x8f   :  { %v74_v18 = vadd.f32 1.0, %v519_v15 }
  0x90   :  { %522 = vrcp.f32 %v73_v16  ;;  %v88_v26 = vand.u32 2147483648, %v73_v16  ;;  %vm82_vm1 = vweird.f32 %v73_v16  ;;  %v86_v28 = vand.u32 2147483647, %v73_v16 }
  0x91   :  { %524 = vrcp.f32 %v74_v18  ;;  %v103_v32 = vand.u32 2147483648, %v74_v18  ;;  %v101_v36 = vand.u32 2147483647, %v74_v18  ;;  %vm97_vm6 = vweird.f32 %v74_v18 }
  0x92   :  { %526 = vpow2.f32 %v445_v17  ;;  %v89_v34 = vor.u32 1.1754944e-38, %v88_v26  ;;  %vm87_vm5 = vcmp.eq.f32.partialorder %v86_v28, 8.507059e+37 }
  0x93   :  { %v104_v42 = vor.u32 1.1754944e-38, %v103_v32  ;;  %vm102_vm9 = vcmp.eq.f32.partialorder %v101_v36, 8.507059e+37 }
  0x94   :  { %v521_v19 = vpop.eup %520 }
  0x95   :  { %v75_v20 = vadd.f32 1.0, %v521_v19 }
  0x96   :  { %v523_v21 = vpop.eup %522 }
  0x97   :  { %v525_v22 = vpop.eup %524  ;;  %v78_v23 = vmul.f32 %v523_v21, %v73_v16  ;;  %528 = vrcp.f32 %v75_v20  ;;  %vm83_vm2 = vweird.f32 %v523_v21  ;;  %vm112_vm10 = vweird.f32 %v75_v20 }
  0x98   :  { %v527_v24 = vpop.eup %526  ;;  %v93_v25 = vmul.f32 %v525_v22, %v74_v18  ;;  %vm601_vm3 = vmor %vm82_vm1, %vm83_vm2  ;;  %vm98_vm4 = vweird.f32 %v525_v22  ;;  %v118_v47 = vand.u32 2147483648, %v75_v20  ;;  %v116_v50 = vand.u32 2147483647, %v75_v20 }
  0x99   :  { %v79_v27 = vsub.f32 1.0, %v78_v23  ;;  %v76_v30 = vadd.f32 1.0, %v527_v24  ;;  %vm99_vm7 = vmor %vm97_vm6, %vm98_vm4 }
  0x9a   :  { %v94_v29 = vsub.f32 1.0, %v93_v25  ;;  %v119_v53 = vor.u32 1.1754944e-38, %v118_v47  ;;  %vm117_vm13 = vcmp.eq.f32.partialorder %v116_v50, 8.507059e+37  ;;  %v560_v50 = vmov 35  }
  0x9b   :  { %v80_v31 = vmul.f32 %v523_v21, %v79_v27  ;;  %530 = vrcp.f32 %v76_v30  ;;  %vm127_vm14 = vweird.f32 %v76_v30  ;;  %v133_v59 = vand.u32 2147483648, %v76_v30  ;;  %496 = vset.pattern.permute.xlu1 %v560_v50  ;;  %495 = vset.pattern.permute.xlu0 %v560_v50 }
  0x9c   :  { %v95_v35 = vmul.f32 %v525_v22, %v94_v29  ;;  %v131_v61 = vand.u32 2147483647, %v76_v30  ;;  %v561_v47 = vmov 0.0  }
  0x9d   :  { %v529_v37 = vpop.eup %528  ;;  %v81_v38 = vadd.f32 %v523_v21, %v80_v31  ;;  %v134_v62 = vor.u32 1.1754944e-38, %v133_v59 }
  0x9e   :  { %v108_v39 = vmul.f32 %v529_v37, %v75_v20  ;;  %v96_v40 = vadd.f32 %v525_v22, %v95_v35  ;;  %vm113_vm11 = vweird.f32 %v529_v37  ;;  %vm132_vm1 = vcmp.eq.f32.partialorder %v131_v61, 8.507059e+37 }
  0x9f   :  { %v85_v41 = vsel %vm601_vm3, %v523_v21, %v81_v38  ;;  %vm114_vm12 = vmor %vm112_vm10, %vm113_vm11 }
  0xa0   :  { %v109_v43 = vsub.f32 1.0, %v108_v39  ;;  %v607_v44 = vsel %vm87_vm5, %v89_v34, %v85_v41  ;;  %v100_v45 = vsel %vm99_vm7, %v525_v22, %v96_v40 }
  0xa1   :  { %154 = vrot.lane.b32.xlu0 %v607_v44, %s558_s0  ;;  %v611_v46 = vsel %vm102_vm9, %v104_v42, %v100_v45  ;;  %v531_v51 = vpop.eup %530  ;;  %v138_v1 = vsel %vm137_vm8, %v607_v44, -inf  ;;  %v178_v16 = vmul.f32 16.0, %v607_v44 }
  0xa2   :  { %v141_v48 = vsel %vm137_vm8, %v611_v46, -inf  ;;  %v110_v49 = vmul.f32 %v529_v37, %v109_v43  ;;  %v123_v55 = vmul.f32 %v531_v51, %v76_v30  ;;  %vm128_vm15 = vweird.f32 %v531_v51 }
  0xa3   :  { %142 = vmax.xlane.f32.xlu2 %v141_v48  ;;  %vm129_vm0 = vmor %vm127_vm14, %vm128_vm15  ;;  %v179_v4 = vmul.f32 16.0, %v611_v46  ;;  %v459_v18 = vceil.f32 %v178_v16  ;;  %v460_v19 = vfloor.f32 %v178_v16  ;;  %vm458_vm5 = vcmp.lt.s32.totalorder %v178_v16, 0 }
  0xa4   :  { %v111_v52 = vadd.f32 %v529_v37, %v110_v49  ;;  %v124_v57 = vsub.f32 1.0, %v123_v55  ;;  %vm236_vm14 = vcmask 1041409   ;;  %vm238_vm15 = vcmask 1042434  }
  0xa5   :  { %v464_v6 = vceil.f32 %v179_v4  ;;  %v465_v7 = vfloor.f32 %v179_v4  ;;  %vm463_vm2 = vcmp.lt.s32.totalorder %v179_v4, 0  ;;  %v461_v23 = vsel %vm458_vm5, %v459_v18, %v460_v19 }
  0xa6   :  { %v115_v54 = vsel %vm114_vm12, %v529_v37, %v111_v52  ;;  %v125_v58 = vmul.f32 %v531_v51, %v124_v57  ;;  %v462_v27 = vcvt.f32.s32 %v461_v23 }
  0xa7   :  { %v615_v56 = vsel %vm117_vm13, %v119_v53, %v115_v54  ;;  %v466_v8 = vsel %vm463_vm2, %v464_v6, %v465_v7 }
  0xa8   :  { %158 = vrot.lane.b32.xlu1 %v615_v56, %s558_s0  ;;  %v126_v60 = vadd.f32 %v531_v51, %v125_v58  ;;  %v144_v2 = vsel %vm137_vm8, %v615_v56, -inf  ;;  %v467_v10 = vcvt.f32.s32 %v466_v8  ;;  %v180_v17 = vmul.f32 16.0, %v615_v56 }
  0xa9   :  { %156 = vrot.lane.b32.xlu0 %v611_v46, %s558_s0  ;;  %vm644_vm9 = vcmp.le.s32.totalorder %v462_v27, 1 }
  0xaa   :  { %v130_v63 = vsel %vm129_vm0, %v531_v51, %v126_v60  ;;  %vm633_vm4 = vcmp.le.s32.totalorder %v467_v10, 1  ;;  %v469_v20 = vceil.f32 %v180_v17  ;;  %v470_v21 = vfloor.f32 %v180_v17 }
  0xab   :  { %v621_v0 = vsel %vm132_vm1, %v134_v62, %v130_v63  ;;  %vm468_vm6 = vcmp.lt.s32.totalorder %v180_v17, 0  ;;  %v214_v60 = vlaneseq  ;;  %vm240_vm0 = vcmask 1043459  }
  0xac   :  { %v147_v3 = vsel %vm137_vm8, %v621_v0, -inf  ;;  %v471_v24 = vsel %vm468_vm6, %v469_v20, %v470_v21  ;;  %v181_v37 = vmul.f32 16.0, %v621_v0  ;;  %vm243_vm1 = vcmask 60416  }
  0xad   :  { %v472_v28 = vcvt.f32.s32 %v471_v24  ;;  %v261_v61 = vshrl.u32 %v214_v60, 7  ;;  %v675_v62 = vand.u32 127, %v214_v60 }
  0xae   :  { %v474_v38 = vceil.f32 %v181_v37  ;;  %v475_v39 = vfloor.f32 %v181_v37  ;;  %vm473_vm11 = vcmp.lt.s32.totalorder %v181_v37, 0 }
  0xaf   :  { %vm650_vm10 = vcmp.le.s32.totalorder %v472_v28, 1  ;;  %499 = vset.pattern.permute.xlu2 %v261_v61 }
  0xb0   :  { %v476_v41 = vsel %vm473_vm11, %v474_v38, %v475_v39 }
  0xb1   :  { %v477_v43 = vcvt.f32.s32 %v476_v41 }
  0xb3   :  { %vm660_vm13 = vcmp.le.s32.totalorder %v477_v43, 1 }
  0xbb   :  { %160 = vrot.lane.b32.xlu2 %v621_v0, %s558_s0 }
  0xd2   :  { %139 = vmax.xlane.f32.xlu1 %v138_v1 }
  0xd3   :  { %145 = vmax.xlane.f32.xlu0 %v144_v2 }
  0xe4   :  { %148 = vmax.xlane.f32.xlu2 %v147_v3 }
 0x113   :  { %v155_v5 = vpop.permute.xlu0 %154 }
 0x114   :  { %v166_v25 = vmul.f32 %v155_v5, %v607_v44 }
 0x116   :  { %v143_v12 = vpop.xlane.xlu2 %142  ;;  %vm170_vm7 = vcmp.gt.f32.partialorder %v166_v25, 0.81 }
 0x11a   :  { %v159_v22 = vpop.permute.xlu1 %158 }
 0x11b   :  { %v157_v9 = vpop.permute.xlu0 %156  ;;  %v168_v26 = vmul.f32 %v159_v22, %v615_v56 }
 0x11c   :  { %v167_v11 = vmul.f32 %v157_v9, %v611_v46 }
 0x11d   :  { %vm172_vm8 = vcmp.gt.f32.partialorder %v168_v26, 0.81 }
 0x11e   :  { %vm171_vm3 = vcmp.gt.f32.partialorder %v167_v11, 0.81  ;;  %v161_v40 = vpop.permute.xlu2 %160 }
 0x11f   :  { %v175_v13 = vsel %vm171_vm3, 0.0, %v143_v12  ;;  %v169_v42 = vmul.f32 %v161_v40, %v621_v0 }
 0x120   :  { %v191_v15 = vsel %vm633_vm4, 0.0, %v175_v13 }
 0x121   :  { %200 = vrot.lane.b32.xlu0 %v191_v15, %s559_s22  ;;  %vm173_vm12 = vcmp.gt.f32.partialorder %v169_v42, 0.81 }
 0x145   :  { %v140_v29 = vpop.xlane.xlu1 %139 }
 0x146   :  { %v174_v31 = vsel %vm170_vm7, 0.0, %v140_v29  ;;  %v146_v32 = vpop.xlane.xlu0 %145 }
 0x147   :  { %v190_v33 = vsel %vm644_vm9, 0.0, %v174_v31  ;;  %v176_v35 = vsel %vm172_vm8, 0.0, %v146_v32 }
 0x148   :  { %v192_v36 = vsel %vm650_vm10, 0.0, %v176_v35  ;;  %198 = vrot.lane.b32.xlu1 %v190_v33, %s559_s22 }
 0x149   :  { %202 = vrot.lane.b32.xlu2 %v192_v36, %s559_s22 }
 0x157   :  { %v149_v45 = vpop.xlane.xlu2 %148 }
 0x158   :  { %v177_v48 = vsel %vm173_vm12, 0.0, %v149_v45 }
 0x159   :  { %v193_v49 = vsel %vm660_vm13, 0.0, %v177_v48 }
 0x15a   :  { %204 = vrot.lane.b32.xlu1 %v193_v49, %s559_s22 }
 0x193   :  { %v201_v51 = vpop.permute.xlu0 %200 }
 0x194   :  { %v211_v52 = vsel %vm633_vm4, 0.0, %v201_v51 }
 0x195   :  { %224 = vperm.xlu1 %496, %v211_v52  }
 0x1a3   :  { %v203_v53 = vpop.permute.xlu2 %202 }
 0x1a4   :  { %v212_v54 = vsel %vm650_vm10, 0.0, %v203_v53 }
 0x1a5   :  { %227 = vperm.xlu1 %496, %v212_v54  }
 0x1ad   :  { %497 = vset.pattern.permute.xlu1 %v261_v61 }
 0x1b5   :  { %264 = vperm.xlu1 %497, %v675_v62  }
 0x1ba   :  { %v199_v55 = vpop.permute.xlu1 %198 }
 0x1bb   :  { %v210_v57 = vsel %vm644_vm9, 0.0, %v199_v55  ;;  %v562_v55 = vmov 33  }
 0x1bc   :  { %221 = vperm.xlu0 %495, %v210_v57  }
 0x1bd   :  { %498 = vset.pattern.permute.xlu1 %v560_v50 }
 0x1cc   :  { %v205_v58 = vpop.permute.xlu1 %204 }
 0x1cd   :  { %v213_v59 = vsel %vm660_vm13, 0.0, %v205_v58 }
 0x1ce   :  { %230 = vperm.xlu0 %495, %v213_v59  }
 0x207   :  { %v225_v63 = vpop.permute.xlu1 %224 }
 0x208   :  { %v233_v3 = vperm.slane %v225_v63, %v675_v62 }
 0x217   :  { %v228_v4 = vpop.permute.xlu1 %227 }
 0x218   :  { %v234_v6 = vperm.slane %v228_v4, %v675_v62 }
 0x227   :  { %v265_v13 = vpop.permute.xlu1 %264 }
 0x22e   :  { %v222_v1 = vpop.permute.xlu0 %221 }
 0x22f   :  { %v232_v2 = vperm.slane %v222_v1, %v675_v62 }
 0x231   :  { %v237_v5 = vsel %vm236_vm14, %v233_v3, %v232_v2 }
 0x232   :  { %v239_v9 = vsel %vm238_vm15, %v234_v6, %v237_v5  ;;  %v563_v5 = vmov 32  }
 0x240   :  { %v231_v7 = vpop.permute.xlu0 %230 }
 0x241   :  { %v235_v8 = vperm.slane %v231_v7, %v675_v62 }
 0x243   :  { %v241_v10 = vsel %vm240_vm0, %v235_v8, %v239_v9 }
 0x244   :  { %v244_v11 = vsel %vm243_vm1, %v241_v10, -inf }
 0x245   :  { %245 = vmax.xlane.f32.xlu2 %v244_v11 }
 0x2b8   :  { %v246_v12 = vpop.xlane.xlu2 %245 }
 0x2b9   :  { %v249_v14 = vperm.slane %v246_v12, 1  ;;  %v248_v15 = vperm.slane %v246_v12, 0  ;;  %v251_v18 = vperm.slane %v246_v12, 3  ;;  %v250_v19 = vperm.slane %v246_v12, 2 }
 0x2bb   :  { %vm257_vm2 = vcmp.eq.f32.partialorder %v211_v52, %v249_v14  ;;  %vm256_vm3 = vcmp.eq.f32.partialorder %v210_v57, %v248_v15  ;;  %vm259_vm4 = vcmp.eq.f32.partialorder %v213_v59, %v251_v18  ;;  %vm258_vm5 = vcmp.eq.f32.partialorder %v212_v54, %v250_v19 }
 0x2bc   :  { %v267_v16 = vsel %vm257_vm2, %v265_v13, 8  ;;  %v266_v17 = vsel %vm256_vm3, %v265_v13, 8  ;;  %v269_v20 = vsel %vm259_vm4, %v265_v13, 8  ;;  %v268_v21 = vsel %vm258_vm5, %v265_v13, 8 }
 0x2bd   :  { %274 = vperm.xlu1 %498, %v267_v16   ;;  %271 = vperm.xlu0 %495, %v266_v17  }
 0x2c5   :  { %280 = vperm.xlu1 %498, %v269_v20   ;;  %277 = vperm.xlu0 %495, %v268_v21  }
 0x2cd   :  { %505 = vset.pattern.permute.xlu0 %v261_v61  ;;  %512 = vset.pattern.permute.xlu1 %v562_v55 }
 0x32f   :  { %v275_v22 = vpop.permute.xlu1 %274  ;;  %v272_v23 = vpop.permute.xlu0 %271 }
 0x330   :  { %v283_v24 = vperm.slane %v275_v22, %v675_v62  ;;  %v282_v25 = vperm.slane %v272_v23, %v675_v62 }
 0x332   :  { %v286_v30 = vsel %vm236_vm14, %v283_v24, %v282_v25 }
 0x337   :  { %v281_v26 = vpop.permute.xlu1 %280  ;;  %v278_v27 = vpop.permute.xlu0 %277 }
 0x338   :  { %v285_v28 = vperm.slane %v281_v26, %v675_v62  ;;  %v284_v29 = vperm.slane %v278_v27, %v675_v62 }
 0x33a   :  { %v287_v31 = vsel %vm238_vm15, %v284_v29, %v286_v30 }
 0x33b   :  { %v288_v32 = vsel %vm240_vm0, %v285_v28, %v287_v31 }
 0x33c   :  { %v289_v33 = vsel %vm243_vm1, %v288_v32, 2147483647 }
 0x33d   :  { %v291_v34 = vshra.s32 %v289_v33, 16  ;;  %v290_v36 = vand.u32 65535, %v289_v33 }
 0x33f   :  { %v293_v35 = vcvt.s32.f32 %v291_v34  ;;  %v292_v38 = vcvt.s32.f32 %v290_v36 }
 0x341   :  { %294 = vmin.xlane.f32.xlu0 %v293_v35 }
 0x3b4   :  { %v295_v37 = vpop.xlane.xlu0 %294 }
 0x3b5   :  { %vm296_vm6 = vcmp.eq.f32.partialorder %v293_v35, %v295_v37  ;;  %v301_v40 = vcvt.f32.s32 %v295_v37 }
 0x3b6   :  { %v297_v39 = vsel %vm296_vm6, %v292_v38, inf }
 0x3b7   :  { %298 = vmin.xlane.f32.xlu1 %v297_v39  ;;  %v302_v42 = vshll.u32 %v301_v40, 16 }
 0x42a   :  { %v299_v41 = vpop.xlane.xlu1 %298 }
 0x42b   :  { %v300_v43 = vcvt.f32.s32 %v299_v41 }
 0x42d   :  { %v303_v45 = vadd.s32 %v302_v42, %v300_v43  ;;  %v408_v42 = vadd.s32 128, %v675_v62 }
 0x42f   :  { %vm304_vm7 = vcmp.eq.s32.totalorder %v675_v62, %v303_v45 }
 0x430   :  { %v446_v48 = vsel %vm304_vm7, 1.0, %v561_v47 }
 0x431   :  { %v322_v49 = vperm.slane %v446_v48, 2  ;;  %v329_v50 = vperm.slane %v446_v48, 3  ;;  %v308_v51 = vperm.slane %v446_v48, 0  ;;  %v315_v52 = vperm.slane %v446_v48, 1 }
 0x433   :  { %v506_v53 = vpack.i.bf16 %v329_v50, %v322_v49  ;;  %v500_v54 = vpack.i.bf16 %v315_v52, %v308_v51 }
 0x435   :  { %507 = vperm.xlu0 %505, %v506_v53   ;;  %501 = vperm.xlu2 %499, %v500_v54  }
 0x43d   :  { %511 = vset.pattern.permute.xlu2 %v562_v55  ;;  %515 = vset.pattern.permute.xlu0 %v562_v55 }
 0x48f   :  { %v502_v57 = vpop.permute.xlu2 %501 }
 0x490   :  { %v504_v58 = vunpack.i.h.bf16 %v502_v57  ;;  %v503_v59 = vunpack.i.l.bf16 %v502_v57 }
 0x492   :  { %v341_v60 = vmul.f32 %v504_v58, %v611_v46  ;;  %v340_v61 = vmul.f32 %v503_v59, %v607_v44 }
 0x494   :  { %377 = vperm.xlu1 %512, %v341_v60   ;;  %374 = vperm.xlu2 %511, %v340_v61  }
 0x4a7   :  { %v508_v63 = vpop.permute.xlu0 %507 }
 0x4a8   :  { %v510_v1 = vunpack.i.h.bf16 %v508_v63  ;;  %v509_v2 = vunpack.i.l.bf16 %v508_v63 }
 0x4aa   :  { %v343_v3 = vmul.f32 %v510_v1, %v621_v0  ;;  %v342_v4 = vmul.f32 %v509_v2, %v615_v56 }
 0x4ac   :  { %383 = vperm.xlu1 %512, %v343_v3   ;;  %380 = vperm.xlu2 %511, %v342_v4  }
 0x4b4   :  { %514 = vset.pattern.permute.xlu1 %v563_v5  ;;  %513 = vset.pattern.permute.xlu2 %v563_v5 }
 0x4b5   :  { %358 = vperm.xlu1 %514, %v343_v3   ;;  %349 = vperm.xlu2 %513, %v340_v61  }
 0x4bd   :  { %352 = vperm.xlu2 %513, %v341_v60  }
 0x4c5   :  { %355 = vperm.xlu2 %513, %v342_v4  }
 0x4ee   :  { %v375_v46 = vpop.permute.xlu2 %374 }
 0x4ef   :  { %v385_v0 = vperm.slane %v375_v46, %v675_v62 }
 0x506   :  { %v381_v44 = vpop.permute.xlu2 %380  ;;  %v378_v7 = vpop.permute.xlu1 %377 }
 0x507   :  { %v386_v9 = vperm.slane %v378_v7, %v675_v62  ;;  %v387_v56 = vperm.slane %v381_v44, %v675_v62 }
 0x509   :  { %v389_v10 = vsel %vm236_vm14, %v386_v9, %v385_v0 }
 0x50a   :  { %v390_v13 = vsel %vm238_vm15, %v387_v56, %v389_v10 }
 0x50f   :  { %v350_v6 = vpop.permute.xlu2 %349 }
 0x510   :  { %v360_v19 = vperm.slane %v350_v6, %v675_v62 }
 0x517   :  { %v353_v8 = vpop.permute.xlu2 %352 }
 0x518   :  { %v361_v17 = vperm.slane %v353_v8, %v675_v62 }
 0x51a   :  { %v364_v21 = vsel %vm236_vm14, %v361_v17, %v360_v19 }
 0x51e   :  { %v384_v11 = vpop.permute.xlu1 %383 }
 0x51f   :  { %v388_v12 = vperm.slane %v384_v11, %v675_v62  ;;  %v356_v15 = vpop.permute.xlu2 %355 }
 0x520   :  { %v362_v18 = vperm.slane %v356_v15, %v675_v62 }
 0x521   :  { %v391_v14 = vsel %vm240_vm0, %v388_v12, %v390_v13 }
 0x522   :  { %v393_v16 = vsel %vm243_vm1, %v391_v14, 0.0  ;;  %v365_v23 = vsel %vm238_vm15, %v362_v18, %v364_v21 }
 0x523   :  { %394 = vadd.xlane.f32.xlu0 %v393_v16 }
 0x527   :  { %v359_v20 = vpop.permute.xlu1 %358 }
 0x528   :  { %v363_v22 = vperm.slane %v359_v20, %v675_v62 }
 0x52a   :  { %v366_v24 = vsel %vm240_vm0, %v363_v22, %v365_v23  ;;  %vm418_vm0 = vcmask 1043456  }
 0x52b   :  { %v368_v25 = vsel %vm243_vm1, %v366_v24, 0.0 }
 0x52c   :  { %369 = vadd.xlane.f32.xlu2 %v368_v25 }
 0x596   :  { %v395_v26 = vpop.xlane.xlu0 %394 }
 0x597   :  { %v396_v27 = vmul.f32 16.0, %v395_v26 }
 0x599   :  { %vm483_vm8 = vcmp.lt.s32.totalorder %v396_v27, 0  ;;  %v484_v28 = vceil.f32 %v396_v27  ;;  %v485_v29 = vfloor.f32 %v396_v27 }
 0x59b   :  { %v486_v30 = vsel %vm483_vm8, %v484_v28, %v485_v29 }
 0x59c   :  { %v487_v31 = vcvt.f32.s32 %v486_v30 }
 0x59e   :  { %vm402_vm9 = vcmp.gt.s32.totalorder %v487_v31, 0 }
 0x59f   :  { %v370_v32 = vpop.xlane.xlu2 %369  ;;  %v403_v33 = vsel %vm402_vm9, %v487_v31, 0 }
 0x5a0   :  { %v371_v34 = vmul.f32 16.0, %v370_v32  ;;  %vm404_vm11 = vcmp.lt.s32.totalorder %v403_v33, 15 }
 0x5a1   :  { %v405_v39 = vsel %vm404_vm11, %v403_v33, 15 }
 0x5a2   :  { %vm478_vm10 = vcmp.lt.s32.totalorder %v371_v34, 0  ;;  %v479_v35 = vceil.f32 %v371_v34  ;;  %v480_v36 = vfloor.f32 %v371_v34  ;;  %v406_v41 = vmul.u32 16, %v405_v39 }
 0x5a4   :  { %v481_v37 = vsel %vm478_vm10, %v479_v35, %v480_v36 }
 0x5a5   :  { %v482_v38 = vcvt.f32.s32 %v481_v37 }
 0x5a7   :  { %vm398_vm12 = vcmp.gt.s32.totalorder %v482_v38, 0 }
 0x5a8   :  { %v399_v40 = vsel %vm398_vm12, %v482_v38, 0 }
 0x5a9   :  { %vm400_vm13 = vcmp.lt.s32.totalorder %v399_v40, 15 }
 0x5aa   :  { %v401_v43 = vsel %vm400_vm13, %v399_v40, 15 }
 0x5ab   :  { %v407_v45 = vadd.s32 %v406_v41, %v401_v43 }
 0x5ad   :  { %vm409_vm14 = vcmp.eq.s32.totalorder %v675_v62, %v407_v45  ;;  %vm410_vm15 = vcmp.eq.s32.totalorder %v408_v42, %v407_v45 }
 0x5ae   :  { %v448_v48 = vsel %vm410_vm15, 1.0, %v561_v47  ;;  %v447_v50 = vsel %vm409_vm14, 1.0, %v561_v47 }
 0x5af   :  { %v417_v49 = vrot.slane %v448_v48, 4 }
 0x5b1   :  { %v419_v51 = vsel %vm418_vm0, %v447_v50, %v417_v49 }
 0x5b2   :  { %421 = vst [vmem:[#allocation2] sm:$0xff] %v419_v51 }
 0x5b3   :  { %432 = dma.vmem_to_hbm [thread:$0]  %s428_s24, 128, %s430_s27, [#allocation3]  }
 0x5b4   :  { %556 = dma.done.wait [#allocation3], 128  }
 0x5b5   :  { %557 = vsyncadd [#allocation3], 4294967168 }
 0x5b6   :  { %437 = vsyncpa [#allocation3], 1 }

</bundles_post_ra>
